<compile_context>
chip_gen: v7x
topology: tpu7x:2x2x1
jax: 0.10.0
libtpu: 0.0.40
codegen_flags: <defaults>
</compile_context>

<pallas_src>
import jax
import jax.numpy as jnp
from jax.experimental import pallas as pl
from jax.experimental.pallas import tpu as pltpu

_LANE = 128
_SUBLANE = 8
_TARGET_BLOCK_BYTES = 2 * 1024 * 1024  # per input block (x4 with in+out double-buffering)

_SHIFT = (-0.030, -0.088, -0.188)
_SCALE = (0.458, 0.448, 0.450)


def _round_up(x, m):
    return (x + m - 1) // m * m


def _round_down(x, m):
    return max(m, (x // m) * m)


def _scaling_kernel(shift_ref, inv_ref, x_ref, o_ref):
    # shift_ref / inv_ref: (tile_rows, 1) f32 column vectors (per row = per channel)
    # x_ref / o_ref:       (tile_rows, tile_cols) blocks
    x = x_ref[...].astype(jnp.float32)
    o_ref[...] = ((x - shift_ref[...]) * inv_ref[...]).astype(o_ref.dtype)


def scaling_layer(inp: jax.Array) -> jax.Array:
    """(inp - shift) / scale with LPIPS per-channel constants. inp: NCHW, C == 3."""
    n, c, h, w = inp.shape
    assert c == 3, "ScalingLayer expects 3 input channels (RGB)"

    rows = n * c
    hw = h * w
    itemsize = jnp.dtype(inp.dtype).itemsize

    # --- column tile: lane-dense multiple of 128 whenever H*W >= 128 ---------
    if hw >= _LANE:
        cols_budget = _round_down(_TARGET_BLOCK_BYTES // (rows * itemsize), _LANE)
        tile_cols = min(_round_down(hw, _LANE), cols_budget)
    else:
        tile_cols = hw  # tiny image: full (possibly masked) row, still correct

    # --- row tile: shrink only if a full-rows block would be huge ------------
    tile_rows = rows
    if rows % _SUBLANE == 0 and rows * tile_cols * itemsize > 2 * _TARGET_BLOCK_BYTES:
        tile_rows = _round_down(_TARGET_BLOCK_BYTES // (tile_cols * itemsize), _SUBLANE)

    grid = (pl.cdiv(rows, tile_rows), pl.cdiv(hw, tile_cols))

    # Per-row constants (row r -> channel r % 3); reciprocal precomputed so the
    # kernel multiplies instead of dividing.
    shift_rows = jnp.tile(jnp.asarray(_SHIFT, jnp.float32), n).reshape(rows, 1)
    inv_rows = jnp.tile(1.0 / jnp.asarray(_SCALE, jnp.float32), n).reshape(rows, 1)

    x2 = inp.reshape(rows, hw)

    out2 = pl.pallas_call(
        _scaling_kernel,
        out_shape=jax.ShapeDtypeStruct((rows, hw), inp.dtype),
        grid=grid,
        in_specs=[
            pl.BlockSpec((tile_rows, 1), lambda i, j: (i, 0)),          # shift
            pl.BlockSpec((tile_rows, 1), lambda i, j: (i, 0)),          # 1/scale
            pl.BlockSpec((tile_rows, tile_cols), lambda i, j: (i, j)),  # x
        ],
        out_specs=pl.BlockSpec((tile_rows, tile_cols), lambda i, j: (i, j)),
        compiler_params=pltpu.CompilerParams(
            dimension_semantics=("parallel", "parallel")
        ),
    )(shift_rows, inv_rows, x2)

    return out2.reshape(n, c, h, w)


if __name__ == "__main__":
    key = jax.random.PRNGKey(0)
    x = jax.random.normal(key, (2, 3, 16, 16), dtype=jnp.float32)

    y = scaling_layer(x)
    jax.block_until_ready(y)

    # Reference check against plain JAX broadcasting (mirrors PyTorch forward).
    shift = jnp.asarray(_SHIFT, jnp.float32)[None, :, None, None]
    scale = jnp.asarray(_SCALE, jnp.float32)[None, :, None, None]
    ref = (x - shift) / scale
    assert y.shape == ref.shape and y.dtype == ref.dtype
    assert jnp.allclose(y, ref, rtol=1e-5, atol=1e-6)

    print("KERNEL_OK")
</pallas_src>

<mosaic_0001>
module attributes {stable_mosaic.version = 11 : i64} {
  func.func @_scaling_kernel(%arg0: i32, %arg1: i32, %arg2: memref<6x1xf32, #tpu.memory_space<vmem>>, %arg3: memref<6x1xf32, #tpu.memory_space<vmem>>, %arg4: memref<6x256xf32, #tpu.memory_space<vmem>>, %arg5: memref<6x256xf32, #tpu.memory_space<vmem>>) attributes {dimension_semantics = [#tpu.dimension_semantics<parallel>, #tpu.dimension_semantics<parallel>], iteration_bounds = array<i64: 1, 1>, scalar_prefetch = 0 : i64, scratch_operands = 0 : i64, tpu.core_type = #tpu.core_type<tc>, window_params = [{transform_indices = @transform_0, window_bounds = array<i64: 6, 1>}, {transform_indices = @transform_1, window_bounds = array<i64: 6, 1>}, {transform_indices = @transform_2, window_bounds = array<i64: 6, 256>}, {transform_indices = @transform_3, window_bounds = array<i64: 6, 256>}]} {
    %c0 = arith.constant 0 : index
    %c0_0 = arith.constant 0 : index
    %0 = vector.load %arg4[%c0, %c0_0] : memref<6x256xf32, #tpu.memory_space<vmem>>, vector<6x256xf32>
    %c0_1 = arith.constant 0 : index
    %c0_2 = arith.constant 0 : index
    %1 = vector.load %arg2[%c0_1, %c0_2] : memref<6x1xf32, #tpu.memory_space<vmem>>, vector<6x1xf32>
    %2 = vector.broadcast %1 : vector<6x1xf32> to vector<6x256xf32>
    %3 = arith.subf %0, %2 : vector<6x256xf32>
    %c0_3 = arith.constant 0 : index
    %c0_4 = arith.constant 0 : index
    %4 = vector.load %arg3[%c0_3, %c0_4] : memref<6x1xf32, #tpu.memory_space<vmem>>, vector<6x1xf32>
    %5 = vector.broadcast %4 : vector<6x1xf32> to vector<6x256xf32>
    %6 = arith.mulf %3, %5 : vector<6x256xf32>
    %c0_5 = arith.constant 0 : index
    %c0_6 = arith.constant 0 : index
    %7 = vector.load %arg5[%c0_5, %c0_6] : memref<6x256xf32, #tpu.memory_space<vmem>>, vector<6x256xf32>
    tpu.vector_store %arg5[%c0_5, %c0_6], %6 {strides = array<i32>} : memref<6x256xf32, #tpu.memory_space<vmem>>, vector<6x256xf32>,
    return
  }
  func.func @transform_0(%arg0: i32, %arg1: i32) -> (i32, i32) {
    %c0_i32 = arith.constant 0 : i32
    %c0_i32_0 = arith.constant 0 : i32
    return %arg0, %c0_i32 : i32, i32
  }
  func.func @transform_1(%arg0: i32, %arg1: i32) -> (i32, i32) {
    %c0_i32 = arith.constant 0 : i32
    %c0_i32_0 = arith.constant 0 : i32
    return %arg0, %c0_i32 : i32, i32
  }
  func.func @transform_2(%arg0: i32, %arg1: i32) -> (i32, i32) {
    %c0_i32 = arith.constant 0 : i32
    return %arg0, %arg1 : i32, i32
  }
  func.func @transform_3(%arg0: i32, %arg1: i32) -> (i32, i32) {
    %c0_i32 = arith.constant 0 : i32
    return %arg0, %arg1 : i32, i32
  }
}

</mosaic_0001>

<bundles_post_ra>
// kernel: tpu_custom_call.1
= control target key start
LH: loop header
LB: loop body
LE: loop exit
PB: predicated region body
PF: predicated region fallthrough
CT: control target
= control target key end

     0   :  { %v76_v1 = vmov 0   ;;  %s122_s0 = inlined_call_operand.vmem [shape: f32[6,1], index: 0, kind: input, shape index: {}]   ;;  %s123_s1 = inlined_call_operand.vmem [shape: f32[6,1], index: 1, kind: input, shape index: {}]   ;;  %s124_s2 = inlined_call_operand.vmem [shape: f32[6,256], index: 2, kind: input, shape index: {}]   ;;  %s125_s3 = inlined_call_operand.hbm [shape: f32[6,256], index: 3, kind: output, shape index: {}]  }
   0x1   :  { %v17_v0 = vld [vmem:[%s122_s0] sm:$0x3f]  ;;  %51 = vset.pattern.permute.xlu0 %v76_v1 }
   0x2   :  { %8 = vsyncpa [#allocation3], 0  ;;  %20 = vperm.xlu0 %51, %v17_v0   ;;  %v25_v2 = vld [vmem:[%s123_s1] sm:$0x3f]  ;;  %v16_v5 = vld [vmem:[%s124_s2 + $0x8] sm:$0x3f] }
   0x3   :  { %v15_v4 = vld [vmem:[%s124_s2] sm:$0x3f]  ;;  %s77_s20 = smov [#allocation2]  }
   0x4   :  { %s41_s0 = sshll.u32 %s77_s20, 4  ;;  %s42_s0 = int_to_ptr.vmem [resolvable:$true] %s41_s0 }
   0x5   :  { %s52_s1 = scalar_lea.vmem %s42_s0, 256  ;;  %p57_p1 = scmp.lt.s32.totalorder %s42_s0, %s42_s0 }
   0x6   :  { %28 = vperm.xlu0 %51, %v25_v2   ;;  %p53_p0 = scmp.ne.s32.totalorder %s42_s0, %s52_s1  ;;  %p58_p2 = scmp.lt.s32.totalorder %s52_s1, %s52_s1 }
   0x8   :  { %p59_p3 = por %p58_p2, %p57_p1 }
   0xa   :  { %p60_p4 = pnand %p59_p3, %p53_p0 }
  0x81   :  { %v21_v3 = vpop.permute.xlu0 %20 }
  0x82   :  { %v23_v6 = vsub.f32 %v15_v4, %v21_v3  ;;  %v24_v7 = vsub.f32 %v16_v5, %v21_v3 }
  0x85   :  { %v29_v8 = vpop.permute.xlu0 %28 }
  0x86   :  { %v31_v9 = vmul.f32 %v29_v8, %v23_v6  ;;  %v32_v10 = vmul.f32 %v29_v8, %v24_v7 }
  0x88   :  { %33 = vst [vmem:[#allocation2] sm:$0x3f] %v31_v9  ;;  %34 = vst [vmem:[#allocation2 + $0x8] sm:$0x3f] %v32_v10 }
  0x89   :  { %63 = shalt.err (!%p60_p4)
}
  0x8a   :  { %s64_s2 = scalar_lea.hbm %s125_s3, 256 }
  0x8b   :  { %p65_p5 = scmp.ne.s32.totalorder %s125_s3, %s64_s2  ;;  %p68_p6 = scmp.lt.u32.totalorder %s64_s2, %s125_s3 }
  0x8d   :  { %p70_p7 = pnand %p68_p6, %p65_p5 }
  0x8f   :  { %73 = shalt.err (!%p70_p7)
}
  0x90   :  { %44 = dma.vmem_to_hbm [thread:$0]  %s42_s0, 256, %s125_s3, [#allocation3]  }
  0x91   :  { %74 = dma.done.wait [#allocation3], 256  }
  0x92   :  { %75 = vsyncadd [#allocation3], 4294967040 }
  0x93   :  { %48 = vsyncpa [#allocation3], 1 }

</bundles_post_ra>
